<compile_context>
chip_gen: v6e
topology: v6e:2x2x1
jax: 0.10.0
libtpu: 0.0.40
codegen_flags: <defaults>
</compile_context>

<pallas_src>
import jax
import jax.numpy as jnp
from jax.experimental import pallas as pl
from jax.experimental.pallas import tpu as pltpu

_LANE = 128   # TPU lane width


def _round_up(x, m):
    return (x + m - 1) // m * m


def _mlp_kernel(x_ref, w1_ref, b1_ref, w2_ref, b2_ref, o_ref):
    nc = o_ref.shape[-1]
    # fc1: (TB, D_in)bf16 @ (D_in, Hp)bf16 -> f32 accumulate on the MXU.
    x = x_ref[...].astype(jnp.bfloat16)          # no-op if x already bf16
    h = jnp.dot(x, w1_ref[...], preferred_element_type=jnp.float32)
    # Bias + ReLU epilogue in f32 (VPU-friendly on all chips incl. v5e).
    h = jnp.maximum(h + b1_ref[...], 0.0)
    # fc2: (TB, Hp)bf16 @ (Hp, Cp)bf16 -> f32 accumulate.
    out = jnp.dot(h.astype(jnp.bfloat16), w2_ref[...],
                  preferred_element_type=jnp.float32)
    # Narrow store: only the real num_classes columns leave the kernel.
    o_ref[...] = (out[:, :nc] + b2_ref[...]).astype(o_ref.dtype)


def prepare_params(w1, b1, w2, b2):
    """One-time parameter prep (do NOT call per forward).

    PyTorch layout in: w1 (H, D_in), b1 (H,), w2 (C, H), b2 (C,).
    Returns weights transposed to (in, out), hidden / w2-output dims padded
    to lane width (128), matmul operands cast to bf16, biases kept f32
    (b2 stays narrow: (1, C)).
    """
    hidden, d_in = w1.shape
    num_classes = w2.shape[0]
    hp = _round_up(hidden, _LANE)
    cp = _round_up(num_classes, _LANE)

    w1_t = jnp.zeros((d_in, hp), jnp.bfloat16).at[:, :hidden].set(
        jnp.transpose(w1).astype(jnp.bfloat16))
    b1_p = jnp.zeros((1, hp), jnp.float32).at[:, :hidden].set(
        b1.astype(jnp.float32))
    w2_t = jnp.zeros((hp, cp), jnp.bfloat16).at[:hidden, :num_classes].set(
        jnp.transpose(w2).astype(jnp.bfloat16))
    b2_n = b2.astype(jnp.float32).reshape(1, num_classes)
    return w1_t, b1_p, w2_t, b2_n, num_classes


def prepare_input(x):
    """One-time input cast to bf16 (do outside the hot path / per-call loop)."""
    return x.astype(jnp.bfloat16)


def weather_classifier_forward(x, w1_t, b1_p, w2_t, b2_n, num_classes,
                               *, block_b=1024):
    """x: (B, D_in) bf16 (or f32). Params from prepare_params().
    Returns (B, num_classes) float32 logits."""
    B, d_in = x.shape
    hp = w1_t.shape[1]
    cp = w2_t.shape[1]

    # Batch tile: large enough to amortize per-step overhead, but capped so
    # that large batches produce >=2 grid steps (both TensorCores on v7x).
    # 8-row aligned; VMEM footprint is <1 MiB even at tb=1024.
    tb = max(8, min(block_b, _round_up(pl.cdiv(B, 2), 8)))
    grid = (pl.cdiv(B, tb),)

    return pl.pallas_call(
        _mlp_kernel,
        out_shape=jax.ShapeDtypeStruct((B, num_classes), jnp.float32),
        grid=grid,
        in_specs=[
            pl.BlockSpec((tb, d_in), lambda i: (i, 0)),        # x: streamed
            pl.BlockSpec((d_in, hp), lambda i: (0, 0)),        # W1: resident
            pl.BlockSpec((1, hp),    lambda i: (0, 0)),        # b1: resident
            pl.BlockSpec((hp, cp),   lambda i: (0, 0)),        # W2: resident
            pl.BlockSpec((1, num_classes), lambda i: (0, 0)),  # b2: resident
        ],
        out_specs=pl.BlockSpec((tb, num_classes), lambda i: (i, 0)),
        compiler_params=pltpu.CompilerParams(
            dimension_semantics=("parallel",)),                # 2 TCs on v7x
    )(x, w1_t, b1_p, w2_t, b2_n)


if __name__ == "__main__":
    # Small shapes consistent with the module's forward.
    batch = 8
    input_dim = 32
    hidden_dim = 64
    num_classes = 8

    key = jax.random.PRNGKey(0)
    kx, kw1, kb1, kw2, kb2 = jax.random.split(key, 5)

    x = jax.random.normal(kx, (batch, input_dim), dtype=jnp.float32)
    # Deterministic "PyTorch-style" init scale (uniform +- 1/sqrt(fan_in)).
    w1 = jax.random.uniform(kw1, (hidden_dim, input_dim), jnp.float32,
                            -1.0 / jnp.sqrt(input_dim), 1.0 / jnp.sqrt(input_dim))
    b1 = jax.random.uniform(kb1, (hidden_dim,), jnp.float32,
                            -1.0 / jnp.sqrt(input_dim), 1.0 / jnp.sqrt(input_dim))
    w2 = jax.random.uniform(kw2, (num_classes, hidden_dim), jnp.float32,
                            -1.0 / jnp.sqrt(hidden_dim), 1.0 / jnp.sqrt(hidden_dim))
    b2 = jax.random.uniform(kb2, (num_classes,), jnp.float32,
                            -1.0 / jnp.sqrt(hidden_dim), 1.0 / jnp.sqrt(hidden_dim))

    # One-time prep (outside the hot path): param transpose/pad + x -> bf16.
    w1_t, b1_p, w2_t, b2_n, nc = prepare_params(w1, b1, w2, b2)
    x_bf16 = prepare_input(x)

    out = weather_classifier_forward(x_bf16, w1_t, b1_p, w2_t, b2_n, nc)
    out = jax.block_until_ready(out)

    # Reference check in plain JAX (f32). Tolerance loosened for bf16 x and
    # bf16 MXU operands (f32 accumulation keeps the error small).
    ref = jnp.maximum(x @ w1.T + b1, 0.0) @ w2.T + b2
    assert out.shape == (batch, num_classes)
    assert jnp.allclose(out, ref, atol=1e-1, rtol=1e-1), (
        float(jnp.max(jnp.abs(out - ref))))

    print("KERNEL_OK")
</pallas_src>

<mosaic_0001>
module attributes {stable_mosaic.version = 11 : i64} {
  func.func @_mlp_kernel(%arg0: i32, %arg1: memref<8x32xbf16, #tpu.memory_space<vmem>>, %arg2: memref<32x128xbf16, #tpu.memory_space<vmem>>, %arg3: memref<1x128xf32, #tpu.memory_space<vmem>>, %arg4: memref<128x128xbf16, #tpu.memory_space<vmem>>, %arg5: memref<1x8xf32, #tpu.memory_space<vmem>>, %arg6: memref<8x8xf32, #tpu.memory_space<vmem>>) attributes {dimension_semantics = [#tpu.dimension_semantics<parallel>], iteration_bounds = array<i64: 1>, scalar_prefetch = 0 : i64, scratch_operands = 0 : i64, tpu.core_type = #tpu.core_type<tc>, window_params = [{transform_indices = @transform_0, window_bounds = array<i64: 8, 32>}, {pipeline_mode = #tpu.pipeline_mode<synchronous>, transform_indices = @transform_1, window_bounds = array<i64: 32, 128>}, {pipeline_mode = #tpu.pipeline_mode<synchronous>, transform_indices = @transform_2, window_bounds = array<i64: 1, 128>}, {pipeline_mode = #tpu.pipeline_mode<synchronous>, transform_indices = @transform_3, window_bounds = array<i64: 128, 128>}, {pipeline_mode = #tpu.pipeline_mode<synchronous>, transform_indices = @transform_4, window_bounds = array<i64: 1, 8>}, {transform_indices = @transform_5, window_bounds = array<i64: 8, 8>}]} {
    %c0 = arith.constant 0 : index
    %c0_0 = arith.constant 0 : index
    %0 = vector.load %arg1[%c0, %c0_0] : memref<8x32xbf16, #tpu.memory_space<vmem>>, vector<8x32xbf16>
    %c0_1 = arith.constant 0 : index
    %c0_2 = arith.constant 0 : index
    %1 = vector.load %arg2[%c0_1, %c0_2] : memref<32x128xbf16, #tpu.memory_space<vmem>>, vector<32x128xbf16>
    %cst = arith.constant dense<0.000000e+00> : vector<8x128xf32>
    %2 = tpu.matmul %0, %1, %cst {dimension_numbers = #tpu.dot_dimension_numbers<[1], [0], [0], [1], [0, 0, 1, 1], [], []>} : vector<8x32xbf16>, vector<32x128xbf16>, vector<8x128xf32> -> vector<8x128xf32>
    %c0_3 = arith.constant 0 : index
    %c0_4 = arith.constant 0 : index
    %3 = vector.load %arg3[%c0_3, %c0_4] : memref<1x128xf32, #tpu.memory_space<vmem>>, vector<1x128xf32>
    %4 = vector.broadcast %3 : vector<1x128xf32> to vector<8x128xf32>
    %5 = arith.addf %2, %4 : vector<8x128xf32>
    %cst_5 = arith.constant 0.000000e+00 : f32
    %6 = vector.broadcast %cst_5 : f32 to vector<8x128xf32>
    %7 = arith.maximumf %5, %6 : vector<8x128xf32>
    %8 = arith.truncf %7 : vector<8x128xf32> to vector<8x128xbf16>
    %c0_6 = arith.constant 0 : index
    %c0_7 = arith.constant 0 : index
    %9 = vector.load %arg4[%c0_6, %c0_7] : memref<128x128xbf16, #tpu.memory_space<vmem>>, vector<128x128xbf16>
    %cst_8 = arith.constant dense<0.000000e+00> : vector<8x128xf32>
    %10 = tpu.matmul %8, %9, %cst_8 {dimension_numbers = #tpu.dot_dimension_numbers<[1], [0], [0], [1], [0, 0, 1, 1], [], []>} : vector<8x128xbf16>, vector<128x128xbf16>, vector<8x128xf32> -> vector<8x128xf32>
    %11 = vector.extract_strided_slice %10 {offsets = [0, 0], sizes = [8, 8], strides = [1, 1]} : vector<8x128xf32> to vector<8x8xf32>
    %c0_9 = arith.constant 0 : index
    %c0_10 = arith.constant 0 : index
    %12 = vector.load %arg5[%c0_9, %c0_10] : memref<1x8xf32, #tpu.memory_space<vmem>>, vector<1x8xf32>
    %13 = vector.broadcast %12 : vector<1x8xf32> to vector<8x8xf32>
    %14 = arith.addf %11, %13 : vector<8x8xf32>
    %c0_11 = arith.constant 0 : index
    %c0_12 = arith.constant 0 : index
    %15 = vector.load %arg6[%c0_11, %c0_12] : memref<8x8xf32, #tpu.memory_space<vmem>>, vector<8x8xf32>
    tpu.vector_store %arg6[%c0_11, %c0_12], %14 {strides = array<i32>} : memref<8x8xf32, #tpu.memory_space<vmem>>, vector<8x8xf32>,
    return
  }
  func.func @transform_0(%arg0: i32) -> (i32, i32) {
    %c0_i32 = arith.constant 0 : i32
    %c0_i32_0 = arith.constant 0 : i32
    return %arg0, %c0_i32 : i32, i32
  }
  func.func @transform_1(%arg0: i32) -> (i32, i32) {
    %c0_i32 = arith.constant 0 : i32
    %c0_i32_0 = arith.constant 0 : i32
    %c0_i32_1 = arith.constant 0 : i32
    return %c0_i32, %c0_i32_0 : i32, i32
  }
  func.func @transform_2(%arg0: i32) -> (i32, i32) {
    %c0_i32 = arith.constant 0 : i32
    %c0_i32_0 = arith.constant 0 : i32
    %c0_i32_1 = arith.constant 0 : i32
    return %c0_i32, %c0_i32_0 : i32, i32
  }
  func.func @transform_3(%arg0: i32) -> (i32, i32) {
    %c0_i32 = arith.constant 0 : i32
    %c0_i32_0 = arith.constant 0 : i32
    %c0_i32_1 = arith.constant 0 : i32
    return %c0_i32, %c0_i32_0 : i32, i32
  }
  func.func @transform_4(%arg0: i32) -> (i32, i32) {
    %c0_i32 = arith.constant 0 : i32
    %c0_i32_0 = arith.constant 0 : i32
    %c0_i32_1 = arith.constant 0 : i32
    return %c0_i32, %c0_i32_0 : i32, i32
  }
  func.func @transform_5(%arg0: i32) -> (i32, i32) {
    %c0_i32 = arith.constant 0 : i32
    %c0_i32_0 = arith.constant 0 : i32
    return %arg0, %c0_i32 : i32, i32
  }
}

</mosaic_0001>

<bundles_post_ra>
// kernel: tpu_custom_call.1
= control target key start
LH: loop header
LB: loop body
LE: loop exit
PB: predicated region body
PF: predicated region fallthrough
CT: control target
= control target key end

     0   :  { %10 = vsyncpa [#allocation3], 0  ;;  %s474_s0 = inlined_call_operand.hbm [shape: bf16[8,32], index: 0, kind: input, shape index: {}]   ;;  %s475_s1 = inlined_call_operand.hbm [shape: bf16[32,128], index: 1, kind: input, shape index: {}]   ;;  %s476_s2 = inlined_call_operand.vmem [shape: f32[1,128], index: 2, kind: input, shape index: {}]   ;;  %s477_s3 = inlined_call_operand.hbm [shape: bf16[128,128], index: 3, kind: input, shape index: {}]   ;;  %s478_s4 = inlined_call_operand.vmem [shape: f32[1,8], index: 4, kind: input, shape index: {}]   ;;  %s479_s5 = inlined_call_operand.hbm [shape: f32[8,8], index: 5, kind: output, shape index: {}]  }
   0x1   :  { %11 = vsyncpa [#allocation6], 0 }
   0x2   :  { %12 = vsyncpa [#allocation4], 0  ;;  %s418_s18 = smov [#allocation5]  }
   0x3   :  { %s28_s19 = sshll.u32 %s418_s18, 4  ;;  %s29_s19 = int_to_ptr.vmem [resolvable:$true] %s28_s19 }
   0x4   :  { %s340_s20 = scalar_lea.vmem %s29_s19, 256  ;;  %p345_p1 = scmp.lt.s32.totalorder %s29_s19, %s29_s19 }
   0x5   :  { %p341_p0 = scmp.ne.s32.totalorder %s29_s19, %s340_s20  ;;  %p346_p2 = scmp.lt.s32.totalorder %s340_s20, %s340_s20 }
   0x7   :  { %p347_p3 = por %p346_p2, %p345_p1 }
   0x9   :  { %p348_p4 = pnand %p347_p3, %p341_p0 }
   0xb   :  { %351 = shalt.err (!%p348_p4)
}
   0xc   :  { %s419_s21 = smov 64   ;;  %s420_s22 = smov 4  }
   0xd   :  { %34 = dma.hbm_to_vmem [thread:$0]  %s475_s1, 256, %s29_s19, [#allocation6], %s419_s21, %s419_s21, %s420_s22  }
   0xe   :  { %s421_s25 = smov [#allocation2]   ;;  %s422_s27 = smov [#allocation7]  }
   0xf   :  { %s19_s26 = sshll.u32 %s421_s25, 4  ;;  %s42_s28 = sshll.u32 %s422_s27, 4  ;;  %s20_s26 = int_to_ptr.vmem [resolvable:$true] %s19_s26  ;;  %s43_s28 = int_to_ptr.vmem [resolvable:$true] %s42_s28 }
  0x10   :  { %s360_s29 = scalar_lea.vmem %s20_s26, 64  ;;  %p365_p6 = scmp.lt.s32.totalorder %s20_s26, %s20_s26 }
  0x11   :  { %p361_p5 = scmp.ne.s32.totalorder %s20_s26, %s360_s29  ;;  %p366_p7 = scmp.lt.s32.totalorder %s360_s29, %s360_s29 }
  0x13   :  { %p367_p8 = por %p366_p7, %p365_p6 }
  0x15   :  { %p368_p9 = pnand %p367_p8, %p361_p5 }
  0x17   :  { %371 = shalt.err (!%p368_p9)
}
  0x18   :  { %22 = dma.hbm_to_vmem [thread:$0]  %s474_s0, 64, %s20_s26, [#allocation3]  }
  0x19   :  { %s380_s7 = scalar_lea.vmem %s43_s28, 1024  ;;  %p385_p11 = scmp.lt.s32.totalorder %s43_s28, %s43_s28 }
  0x1a   :  { %p381_p10 = scmp.ne.s32.totalorder %s43_s28, %s380_s7  ;;  %p386_p12 = scmp.lt.s32.totalorder %s380_s7, %s380_s7 }
  0x1c   :  { %p387_p13 = por %p386_p12, %p385_p11 }
  0x1e   :  { %p388_p0 = pnand %p387_p13, %p381_p10 }
  0x20   :  { %391 = shalt.err (!%p388_p0)
}
  0x21   :  { %48 = dma.hbm_to_vmem [thread:$0]  %s477_s3, 1024, %s43_s28, [#allocation6], %s419_s21, %s419_s21, %s420_s22  }
  0x22   :  { %412 = dma.done.wait [#allocation3], 64  }
  0x23   :  { %413 = vsyncadd [#allocation3], 4294967232 }
  0x24   :  { %414 = dma.done.wait [#allocation6], 1280  }
  0x25   :  { %415 = vsyncadd [#allocation6], 4294966016  ;;  %v423_v0 = vmov 0.0   ;;  %vm424_vm0 = vmmov 0   ;;  %v322_v1 = vld [vmem:[#allocation5 + $0x8] sm:$0xff]   ;;  %v323_v2 = vld [vmem:[#allocation5] sm:$0xff]  }
  0x26   :  { %286 = vmatprep.subr.bf16.mxu0 %v423_v0  ;;  %290 = vmatprep.mubr.msk.bf16.mxu0 %vm424_vm0, %v423_v0  ;;  %v324_v3 = vld [vmem:[#allocation7 + $0x38] sm:$0xff]   ;;  %vm85_vm1 = vcmask 261120   ;;  %v325_v4 = vld [vmem:[#allocation7 + $0x30] sm:$0xff]   ;;  %v61_v5 = vld [vmem:[#allocation2] sm:$0xf]  ;;  %s425_s11 = smov [#allocation8]  }
  0x27   :  { %294 = vmatprep.subr.bf16.mxu1 %v423_v0  ;;  %310 = vmatprep.mubr.msk.bf16.mxu1 %vm424_vm0, %v423_v0  ;;  %v326_v6 = vld [vmem:[#allocation7 + $0x28] sm:$0xff]   ;;  %v327_v7 = vld [vmem:[#allocation7 + $0x20] sm:$0xff]   ;;  %v328_v8 = vld [vmem:[#allocation7 + $0x18] sm:$0xff]   ;;  %s251_s12 = sshll.u32 %s425_s11, 4  ;;  %vm243_vm2 = vcmask 64512   ;;  %s252_s12 = int_to_ptr.vmem [resolvable:$true] %s251_s12 }
  0x28   :  { %287 = vmatpush3.bf16.msra.mxu0 %v322_v1  ;;  %295 = vmatpush3.bf16.msra.mxu1 %v324_v3  ;;  %v329_v9 = vld [vmem:[#allocation7 + $0x10] sm:$0xff]   ;;  %v330_v10 = vld [vmem:[#allocation7 + $0x8] sm:$0xff]   ;;  %v331_v11 = vld [vmem:[#allocation7] sm:$0xff]   ;;  %p397_p2 = scmp.lt.s32.totalorder %s252_s12, %s252_s12 }
  0x29   :  { %288 = vmatprep.subr.bf16.mxu0 %v423_v0  ;;  %296 = vmatprep.subr.bf16.mxu1 %v423_v0  ;;  %v261_v12 = vld [vmem:[%s476_s2] ss:$0 sm:$0xff]  ;;  %s392_s2 = scalar_lea.vmem %s252_s12, 128 }
  0x2a   :  { %v273_v20 = vld [vmem:[%s478_s4] ss:$0 sm:$0xff]  ;;  %p393_p1 = scmp.ne.s32.totalorder %s252_s12, %s392_s2  ;;  %p398_p3 = scmp.lt.s32.totalorder %s392_s2, %s392_s2 }
  0x2c   :  { %289 = vmatpush3.bf16.msra.mxu0 %v323_v2  ;;  %297 = vmatpush3.bf16.msra.mxu1 %v325_v4  ;;  %p399_p4 = por %p398_p3, %p397_p2 }
  0x2d   :  { %298 = vmatprep.subr.bf16.mxu1 %v423_v0 }
  0x2e   :  { %p400_p5 = pnand %p399_p4, %p393_p1 }
  0x2f   :  { %291 = vmatmul.mubr.msk.bf16.vlgmr.msra.gmra.mxu0 %vm85_vm1, %v61_v5 }
  0x30   :  { %299 = vmatpush3.bf16.msra.mxu1 %v326_v6 }
  0x31   :  { %300 = vmatprep.subr.bf16.mxu1 %v423_v0 }
  0x34   :  { %301 = vmatpush3.bf16.msra.mxu1 %v327_v7 }
  0x35   :  { %302 = vmatprep.subr.bf16.mxu1 %v423_v0 }
  0x38   :  { %303 = vmatpush3.bf16.msra.mxu1 %v328_v8 }
  0x39   :  { %304 = vmatprep.subr.bf16.mxu1 %v423_v0 }
  0x3c   :  { %305 = vmatpush3.bf16.msra.mxu1 %v329_v9 }
  0x3d   :  { %306 = vmatprep.subr.bf16.mxu1 %v423_v0 }
  0x40   :  { %307 = vmatpush3.bf16.msra.mxu1 %v330_v10 }
  0x41   :  { %308 = vmatprep.subr.bf16.mxu1 %v423_v0 }
  0x44   :  { %309 = vmatpush3.bf16.msra.mxu1 %v331_v11 }
  0xef   :  { %v123_v13 = vpop.f32.mrf.mxu0 }
  0xf0   :  { %v124_v14 = vadd.f32 %v261_v12, %v123_v13 }
  0xf1   :  { %v292_v15 = vpop.f32.mrf.mxu0 }
  0xf2   :  { %v129_v16 = vmax.f32 %v124_v14, 0.0 }
  0xf3   :  { %v126_v17 = vpop.f32.mrf.mxu0 }
  0xf4   :  { %v130_v18 = vpack.c.bf16 %v129_v16, %v129_v16 }
  0xf5   :  { %v293_v19 = vpop.f32.mrf.mxu0 }
  0xf6   :  { %311 = vmatmul.mubr.bf16.vlgmr.msra.gmra.mxu1 %v130_v18 }
 0x1b6   :  { %v229_v21 = vpop.f32.mrf.mxu1 }
 0x1b7   :  { %v242_v22 = vadd.f32 %v273_v20, %v229_v21 }
 0x1b8   :  { %v312_v23 = vpop.f32.mrf.mxu1 }
 0x1b9   :  { %244 = vst.msk [vmem:[#allocation8] sm:$0xff] %vm243_vm2, %v242_v22 }
 0x1ba   :  { %v232_v24 = vpop.f32.mrf.mxu1 }
 0x1bb   :  { %403 = shalt.err (!%p400_p5)
}
 0x1bc   :  { %254 = dma.vmem_to_hbm [thread:$0]  %s252_s12, 128, %s479_s5, [#allocation4]   ;;  %v313_v25 = vpop.f32.mrf.mxu1 }
 0x1bd   :  { %416 = dma.done.wait [#allocation4], 128  }
 0x1be   :  { %417 = vsyncadd [#allocation4], 4294967168 }
 0x1bf   :  { %258 = vsyncpa [#allocation3], 1 }
 0x1c0   :  { %259 = vsyncpa [#allocation6], 1 }
 0x1c1   :  { %260 = vsyncpa [#allocation4], 1 }

</bundles_post_ra>
